<compile_context>
chip_gen: v6e
topology: v6e:2x2x1
jax: 0.10.0
libtpu: 0.0.40
codegen_flags: <defaults>
</compile_context>

<pallas_src>
import math
from functools import partial

import jax
import jax.numpy as jnp
from jax import lax
from jax.experimental import pallas as pl
from jax.experimental.pallas import tpu as pltpu


# ----------------------------------------------------------------------------
# Fused kernel: patch-embedding -> fused QKV -> attention -> mean-pool + cls.
# One grid step per batch element; everything for that element lives in VMEM.
# Outputs:
#   tokens (1, L, D)      : "embedding" hook
#   qkvh   (1, L, 4*Dk)   : [Q | K | V | H] packed lane-dense (4*32 = 128)
#   A      (1, L, L)      : attention map
#   logits (1, 1, NC)     : classifier output
# ----------------------------------------------------------------------------
def _fused_vit_kernel(p_ref, we_ref, be_ref, wqkv_ref, wc_ref, bc_ref,
                      tok_ref, qkvh_ref, a_ref, logit_ref,
                      *, scale, dk, inv_l):
    bf16 = jnp.bfloat16
    x = p_ref[0]                                                     # (L, pdim)

    # --- patch embedding: bf16 MXU inputs, f32 accumulation ------------------
    tokens = (jnp.dot(x.astype(bf16), we_ref[...].astype(bf16),
                      preferred_element_type=jnp.float32)
              + be_ref[...])                                          # (L, D)
    tok_ref[0] = tokens

    # --- fused QKV projection: one wide (D, 3*Dk) matmul ---------------------
    qkv = jnp.dot(tokens.astype(bf16), wqkv_ref[...].astype(bf16),
                  preferred_element_type=jnp.float32)                 # (L, 3Dk)
    q = qkv[:, :dk]
    k = qkv[:, dk:2 * dk]
    v = qkv[:, 2 * dk:]

    # --- attention scores: contract last dims (no explicit k.T) --------------
    s = lax.dot_general(q.astype(bf16), k.astype(bf16),
                        dimension_numbers=(((1,), (1,)), ((), ())),
                        preferred_element_type=jnp.float32) * scale   # (L, L)
    s = s - jnp.max(s, axis=-1, keepdims=True)
    p = jnp.exp(s)                                                    # f32 EUP
    a = p * pl.reciprocal(jnp.sum(p, axis=-1, keepdims=True), approx=True)
    h = jnp.dot(a.astype(bf16), v.astype(bf16),
                preferred_element_type=jnp.float32)                   # (L, Dk)

    # --- lane-dense packed writeback: [Q|K|V|H] -> 128 lanes ------------------
    qkvh_ref[0] = jnp.concatenate([qkv, h], axis=-1)
    a_ref[0] = a

    # --- mean-pool over tokens + classifier -----------------------------------
    pooled = jnp.sum(h, axis=0, keepdims=True) * inv_l                # (1, Dk)
    logit_ref[0] = (jnp.dot(pooled.astype(bf16), wc_ref[...].astype(bf16),
                            preferred_element_type=jnp.float32)
                    + bc_ref[...])


def fused_vit_forward(patches, w_embed, b_embed, w_qkv, w_cls, b_cls, *, dk):
    b, l, pdim = patches.shape
    d = w_embed.shape[1]
    nc = w_cls.shape[1]
    scale = 1.0 / math.sqrt(dk)

    tokens, qkvh, a, logits = pl.pallas_call(
        partial(_fused_vit_kernel, scale=scale, dk=dk, inv_l=1.0 / l),
        out_shape=(
            jax.ShapeDtypeStruct((b, l, d), jnp.float32),
            jax.ShapeDtypeStruct((b, l, 4 * dk), jnp.float32),
            jax.ShapeDtypeStruct((b, l, l), jnp.float32),
            jax.ShapeDtypeStruct((b, 1, nc), jnp.float32),
        ),
        grid=(b,),
        in_specs=[
            pl.BlockSpec((1, l, pdim), lambda i: (i, 0, 0)),
            pl.BlockSpec((pdim, d), lambda i: (0, 0)),
            pl.BlockSpec((1, d), lambda i: (0, 0)),
            pl.BlockSpec((d, 3 * dk), lambda i: (0, 0)),
            pl.BlockSpec((dk, nc), lambda i: (0, 0)),
            pl.BlockSpec((1, nc), lambda i: (0, 0)),
        ],
        out_specs=(
            pl.BlockSpec((1, l, d), lambda i: (i, 0, 0)),
            pl.BlockSpec((1, l, 4 * dk), lambda i: (i, 0, 0)),
            pl.BlockSpec((1, l, l), lambda i: (i, 0, 0)),
            pl.BlockSpec((1, 1, nc), lambda i: (i, 0, 0)),
        ),
        compiler_params=pltpu.CompilerParams(
            dimension_semantics=("parallel",)),
    )(patches, w_embed, b_embed.reshape(1, d), w_qkv,
      w_cls, b_cls.reshape(1, nc))
    return tokens, qkvh, a, logits[:, 0, :]


# ----------------------------------------------------------------------------
# Synthetic model + Visualizer wrapper (hooks become explicit feature returns).
# ----------------------------------------------------------------------------
def extract_patches(x, patch):
    # x: (B, C, H, W) NCHW -> (B, L, C*patch*patch)
    b, c, h, w = x.shape
    x = x.reshape(b, c, h // patch, patch, w // patch, patch)
    x = jnp.transpose(x, (0, 2, 4, 1, 3, 5))        # (B, Hp, Wp, C, p, p)
    return x.reshape(b, (h // patch) * (w // patch), c * patch * patch)


class TinyViT:
    """embedding -> mha.head -> pool -> classifier, fused in one Pallas call."""

    def __init__(self, key, in_ch, patch, d_model, d_k, num_classes):
        ks = jax.random.split(key, 7)
        pdim = in_ch * patch * patch
        self.patch = patch
        self.d_k = d_k
        self.w_embed = jax.random.normal(ks[0], (pdim, d_model), jnp.float32) * 0.05
        self.b_embed = jax.random.normal(ks[1], (d_model,), jnp.float32) * 0.01
        self.wq = jax.random.normal(ks[2], (d_model, d_k), jnp.float32) * 0.05
        self.wk = jax.random.normal(ks[3], (d_model, d_k), jnp.float32) * 0.05
        self.wv = jax.random.normal(ks[4], (d_model, d_k), jnp.float32) * 0.05
        self.w_cls = jax.random.normal(ks[5], (d_k, num_classes), jnp.float32) * 0.05
        self.b_cls = jax.random.normal(ks[6], (num_classes,), jnp.float32) * 0.01
        # one-time QKV weight fusion (wrapper-side, outside the per-batch loop)
        self.w_qkv = jnp.concatenate([self.wq, self.wk, self.wv], axis=1)

    def __call__(self, x):
        patches = extract_patches(x, self.patch)                 # (B, L, pdim)
        tokens, qkvh, a, logits = fused_vit_forward(
            patches, self.w_embed, self.b_embed, self.w_qkv,
            self.w_cls, self.b_cls, dk=self.d_k)
        dk = self.d_k
        intermediates = {
            "embedding": tokens,
            "mha.head": qkvh[..., 3 * dk:],
            "mha.head.Q": qkvh[..., :dk],
            "mha.head.K": qkvh[..., dk:2 * dk],
            "mha.head.V": qkvh[..., 2 * dk:3 * dk],
            "mha.head.A": a,
        }
        return logits, intermediates


class Visualizer:
    """JAX analogue of the PyTorch Visualizer: forward(x) = model(x); forward
    hooks on the requested layers populate self._features (incl. Q/K/V/A for
    mha.head layers).  Features are fetched with a single batched device_get."""

    def __init__(self, model, layers):
        self.model = model
        self.layers = layers
        self._features = dict()

    def forward(self, x):
        out, inter = self.model(x)
        wanted = dict()
        for layer in self.layers:
            wanted[layer] = inter[layer]
            if layer.find("mha.head") >= 0:
                for t in ("Q", "K", "V", "A"):
                    wanted[layer + "." + t] = inter[layer + "." + t]
        # one host transfer for all hooked features (no per-tensor sync)
        self._features.update(jax.device_get(wanted))
        return out

    # TODO(synk): step / collect_features / PCA / plotting / create_gif are
    # host-side bookkeeping + matplotlib/imageio and are not kernel-relevant.


# ----------------------------------------------------------------------------
# Pure-JAX f32 reference for numerical verification (kernel uses bf16 MXU
# inputs, so tolerances are relaxed accordingly).
# ----------------------------------------------------------------------------
def reference_forward(model, x):
    patches = extract_patches(x, model.patch)
    tokens = patches @ model.w_embed + model.b_embed
    q = tokens @ model.wq
    k = tokens @ model.wk
    v = tokens @ model.wv
    s = jnp.einsum("bld,bmd->blm", q, k) / math.sqrt(model.wq.shape[1])
    a = jax.nn.softmax(s, axis=-1)
    h = jnp.einsum("blm,bmd->bld", a, v)
    logits = jnp.mean(h, axis=1) @ model.w_cls + model.b_cls
    return logits, h, q, k, v, a


if __name__ == "__main__":
    key = jax.random.PRNGKey(0)
    k_model, k_x = jax.random.split(key)

    B, C, H, W = 2, 4, 16, 16
    PATCH, D_MODEL, D_K, NUM_CLASSES = 4, 32, 32, 10

    model = TinyViT(k_model, C, PATCH, D_MODEL, D_K, NUM_CLASSES)
    vis = Visualizer(model, layers=["embedding", "mha.head"])

    x = jax.random.normal(k_x, (B, C, H, W), jnp.float32)

    logits = vis.forward(x)
    logits = jax.block_until_ready(logits)

    # sanity check against pure-JAX f32 reference (bf16 MXU inputs -> relaxed tol)
    ref_logits, ref_h, ref_q, ref_k, ref_v, ref_a = reference_forward(model, x)
    TOL = dict(atol=2e-2, rtol=2e-2)
    assert jnp.allclose(logits, ref_logits, **TOL)
    assert jnp.allclose(vis._features["embedding"],
                        extract_patches(x, PATCH) @ model.w_embed + model.b_embed,
                        **TOL)
    assert jnp.allclose(vis._features["mha.head"], ref_h, **TOL)
    assert jnp.allclose(vis._features["mha.head.Q"], ref_q, **TOL)
    assert jnp.allclose(vis._features["mha.head.K"], ref_k, **TOL)
    assert jnp.allclose(vis._features["mha.head.V"], ref_v, **TOL)
    assert jnp.allclose(vis._features["mha.head.A"], ref_a, **TOL)

    print("KERNEL_OK")
</pallas_src>

<mosaic_0001>
module attributes {stable_mosaic.version = 11 : i64} {
  func.func @_fused_vit_kernel(%arg0: i32, %arg1: memref<1x16x64xf32, #tpu.memory_space<vmem>>, %arg2: memref<64x32xf32, #tpu.memory_space<vmem>>, %arg3: memref<1x32xf32, #tpu.memory_space<vmem>>, %arg4: memref<32x96xf32, #tpu.memory_space<vmem>>, %arg5: memref<32x10xf32, #tpu.memory_space<vmem>>, %arg6: memref<1x10xf32, #tpu.memory_space<vmem>>, %arg7: memref<1x16x32xf32, #tpu.memory_space<vmem>>, %arg8: memref<1x16x128xf32, #tpu.memory_space<vmem>>, %arg9: memref<1x16x16xf32, #tpu.memory_space<vmem>>, %arg10: memref<1x1x10xf32, #tpu.memory_space<vmem>>) attributes {dimension_semantics = [#tpu.dimension_semantics<parallel>], iteration_bounds = array<i64: 2>, scalar_prefetch = 0 : i64, scratch_operands = 0 : i64, tpu.core_type = #tpu.core_type<tc>, window_params = [{transform_indices = @transform_0, window_bounds = array<i64: 1, 16, 64>}, {pipeline_mode = #tpu.pipeline_mode<synchronous>, transform_indices = @transform_1, window_bounds = array<i64: 64, 32>}, {pipeline_mode = #tpu.pipeline_mode<synchronous>, transform_indices = @transform_2, window_bounds = array<i64: 1, 32>}, {pipeline_mode = #tpu.pipeline_mode<synchronous>, transform_indices = @transform_3, window_bounds = array<i64: 32, 96>}, {pipeline_mode = #tpu.pipeline_mode<synchronous>, transform_indices = @transform_4, window_bounds = array<i64: 32, 10>}, {pipeline_mode = #tpu.pipeline_mode<synchronous>, transform_indices = @transform_5, window_bounds = array<i64: 1, 10>}, {transform_indices = @transform_6, window_bounds = array<i64: 1, 16, 32>}, {transform_indices = @transform_7, window_bounds = array<i64: 1, 16, 128>}, {transform_indices = @transform_8, window_bounds = array<i64: 1, 16, 16>}, {transform_indices = @transform_9, window_bounds = array<i64: 1, 1, 10>}]} {
    %c0 = arith.constant 0 : index
    %c0_0 = arith.constant 0 : index
    %c0_1 = arith.constant 0 : index
    %0 = vector.load %arg1[%c0, %c0_0, %c0_1] : memref<1x16x64xf32, #tpu.memory_space<vmem>>, vector<1x16x64xf32>
    %1 = vector.shape_cast %0 : vector<1x16x64xf32> to vector<16x64xf32>
    %2 = arith.truncf %1 : vector<16x64xf32> to vector<16x64xbf16>
    %c0_2 = arith.constant 0 : index
    %c0_3 = arith.constant 0 : index
    %3 = vector.load %arg2[%c0_2, %c0_3] : memref<64x32xf32, #tpu.memory_space<vmem>>, vector<64x32xf32>
    %4 = arith.truncf %3 : vector<64x32xf32> to vector<64x32xbf16>
    %cst = arith.constant dense<0.000000e+00> : vector<16x32xf32>
    %5 = tpu.matmul %2, %4, %cst {dimension_numbers = #tpu.dot_dimension_numbers<[1], [0], [0], [1], [0, 0, 1, 1], [], []>} : vector<16x64xbf16>, vector<64x32xbf16>, vector<16x32xf32> -> vector<16x32xf32>
    %c0_4 = arith.constant 0 : index
    %c0_5 = arith.constant 0 : index
    %6 = vector.load %arg3[%c0_4, %c0_5] : memref<1x32xf32, #tpu.memory_space<vmem>>, vector<1x32xf32>
    %7 = vector.broadcast %6 : vector<1x32xf32> to vector<16x32xf32>
    %8 = arith.addf %5, %7 : vector<16x32xf32>
    %c0_6 = arith.constant 0 : index
    %c0_7 = arith.constant 0 : index
    %c0_8 = arith.constant 0 : index
    %9 = vector.load %arg7[%c0_6, %c0_7, %c0_8] : memref<1x16x32xf32, #tpu.memory_space<vmem>>, vector<1x16x32xf32>
    %10 = vector.shape_cast %9 : vector<1x16x32xf32> to vector<16x32xf32>
    %11 = vector.shape_cast %8 : vector<16x32xf32> to vector<1x16x32xf32>
    tpu.vector_store %arg7[%c0_6, %c0_7, %c0_8], %11 {strides = array<i32>} : memref<1x16x32xf32, #tpu.memory_space<vmem>>, vector<1x16x32xf32>,
    %12 = arith.truncf %8 : vector<16x32xf32> to vector<16x32xbf16>
    %c0_9 = arith.constant 0 : index
    %c0_10 = arith.constant 0 : index
    %13 = vector.load %arg4[%c0_9, %c0_10] : memref<32x96xf32, #tpu.memory_space<vmem>>, vector<32x96xf32>
    %14 = arith.truncf %13 : vector<32x96xf32> to vector<32x96xbf16>
    %cst_11 = arith.constant dense<0.000000e+00> : vector<16x96xf32>
    %15 = tpu.matmul %12, %14, %cst_11 {dimension_numbers = #tpu.dot_dimension_numbers<[1], [0], [0], [1], [0, 0, 1, 1], [], []>} : vector<16x32xbf16>, vector<32x96xbf16>, vector<16x96xf32> -> vector<16x96xf32>
    %16 = vector.extract_strided_slice %15 {offsets = [0, 0], sizes = [16, 32], strides = [1, 1]} : vector<16x96xf32> to vector<16x32xf32>
    %17 = vector.extract_strided_slice %15 {offsets = [0, 32], sizes = [16, 32], strides = [1, 1]} : vector<16x96xf32> to vector<16x32xf32>
    %18 = vector.extract_strided_slice %15 {offsets = [0, 64], sizes = [16, 32], strides = [1, 1]} : vector<16x96xf32> to vector<16x32xf32>
    %19 = arith.truncf %16 : vector<16x32xf32> to vector<16x32xbf16>
    %20 = arith.truncf %17 : vector<16x32xf32> to vector<16x32xbf16>
    %cst_12 = arith.constant dense<0.000000e+00> : vector<16x16xf32>
    %21 = tpu.matmul %19, %20, %cst_12 {dimension_numbers = #tpu.dot_dimension_numbers<[1], [1], [0], [0], [0, 0, 1, 0], [], []>} : vector<16x32xbf16>, vector<16x32xbf16>, vector<16x16xf32> -> vector<16x16xf32>
    %cst_13 = arith.constant 0.176776692 : f32
    %22 = vector.broadcast %cst_13 : f32 to vector<16x16xf32>
    %23 = arith.mulf %21, %22 : vector<16x16xf32>
    %cst_14 = arith.constant dense<0xFF800000> : vector<16xf32>
    %24 = vector.multi_reduction <maximumf>, %23, %cst_14 [1] : vector<16x16xf32> to vector<16xf32>
    %25 = vector.shape_cast %24 : vector<16xf32> to vector<16x1xf32>
    %26 = vector.broadcast %25 : vector<16x1xf32> to vector<16x16xf32>
    %27 = arith.subf %23, %26 : vector<16x16xf32>
    %28 = math.exp %27 : vector<16x16xf32>
    %cst_15 = arith.constant dense<0.000000e+00> : vector<16xf32>
    %29 = vector.multi_reduction <add>, %28, %cst_15 [1] : vector<16x16xf32> to vector<16xf32>
    %30 = vector.shape_cast %29 : vector<16xf32> to vector<16x1xf32>
    %31 = tpu.reciprocal %30 {approx = true} : vector<16x1xf32> -> vector<16x1xf32>
    %32 = vector.broadcast %31 : vector<16x1xf32> to vector<16x16xf32>
    %33 = arith.mulf %28, %32 : vector<16x16xf32>
    %34 = arith.truncf %33 : vector<16x16xf32> to vector<16x16xbf16>
    %35 = arith.truncf %18 : vector<16x32xf32> to vector<16x32xbf16>
    %cst_16 = arith.constant dense<0.000000e+00> : vector<16x32xf32>
    %36 = tpu.matmul %34, %35, %cst_16 {dimension_numbers = #tpu.dot_dimension_numbers<[1], [0], [0], [1], [0, 0, 1, 1], [], []>} : vector<16x16xbf16>, vector<16x32xbf16>, vector<16x32xf32> -> vector<16x32xf32>
    %37 = tpu.concatenate %15, %36 in 1 : vector<16x96xf32>, vector<16x32xf32> -> vector<16x128xf32>
    %c0_17 = arith.constant 0 : index
    %c0_18 = arith.constant 0 : index
    %c0_19 = arith.constant 0 : index
    %38 = vector.load %arg8[%c0_17, %c0_18, %c0_19] : memref<1x16x128xf32, #tpu.memory_space<vmem>>, vector<1x16x128xf32>
    %39 = vector.shape_cast %38 : vector<1x16x128xf32> to vector<16x128xf32>
    %40 = vector.shape_cast %37 : vector<16x128xf32> to vector<1x16x128xf32>
    tpu.vector_store %arg8[%c0_17, %c0_18, %c0_19], %40 {strides = array<i32>} : memref<1x16x128xf32, #tpu.memory_space<vmem>>, vector<1x16x128xf32>,
    %c0_20 = arith.constant 0 : index
    %c0_21 = arith.constant 0 : index
    %c0_22 = arith.constant 0 : index
    %41 = vector.load %arg9[%c0_20, %c0_21, %c0_22] : memref<1x16x16xf32, #tpu.memory_space<vmem>>, vector<1x16x16xf32>
    %42 = vector.shape_cast %41 : vector<1x16x16xf32> to vector<16x16xf32>
    %43 = vector.shape_cast %33 : vector<16x16xf32> to vector<1x16x16xf32>
    tpu.vector_store %arg9[%c0_20, %c0_21, %c0_22], %43 {strides = array<i32>} : memref<1x16x16xf32, #tpu.memory_space<vmem>>, vector<1x16x16xf32>,
    %cst_23 = arith.constant dense<0.000000e+00> : vector<32xf32>
    %44 = vector.multi_reduction <add>, %36, %cst_23 [0] : vector<16x32xf32> to vector<32xf32>
    %45 = vector.shape_cast %44 : vector<32xf32> to vector<1x32xf32>
    %cst_24 = arith.constant 6.250000e-02 : f32
    %46 = vector.broadcast %cst_24 : f32 to vector<1x32xf32>
    %47 = arith.mulf %45, %46 : vector<1x32xf32>
    %48 = arith.truncf %47 : vector<1x32xf32> to vector<1x32xbf16>
    %c0_25 = arith.constant 0 : index
    %c0_26 = arith.constant 0 : index
    %49 = vector.load %arg5[%c0_25, %c0_26] : memref<32x10xf32, #tpu.memory_space<vmem>>, vector<32x10xf32>
    %50 = arith.truncf %49 : vector<32x10xf32> to vector<32x10xbf16>
    %cst_27 = arith.constant dense<0.000000e+00> : vector<1x10xf32>
    %51 = tpu.matmul %48, %50, %cst_27 {dimension_numbers = #tpu.dot_dimension_numbers<[1], [0], [0], [1], [0, 0, 1, 1], [], []>} : vector<1x32xbf16>, vector<32x10xbf16>, vector<1x10xf32> -> vector<1x10xf32>
    %c0_28 = arith.constant 0 : index
    %c0_29 = arith.constant 0 : index
    %52 = vector.load %arg6[%c0_28, %c0_29] : memref<1x10xf32, #tpu.memory_space<vmem>>, vector<1x10xf32>
    %53 = arith.addf %51, %52 : vector<1x10xf32>
    %c0_30 = arith.constant 0 : index
    %c0_31 = arith.constant 0 : index
    %c0_32 = arith.constant 0 : index
    %54 = vector.load %arg10[%c0_30, %c0_31, %c0_32] : memref<1x1x10xf32, #tpu.memory_space<vmem>>, vector<1x1x10xf32>
    %55 = vector.shape_cast %54 : vector<1x1x10xf32> to vector<1x10xf32>
    %56 = vector.shape_cast %53 : vector<1x10xf32> to vector<1x1x10xf32>
    tpu.vector_store %arg10[%c0_30, %c0_31, %c0_32], %56 {strides = array<i32>} : memref<1x1x10xf32, #tpu.memory_space<vmem>>, vector<1x1x10xf32>,
    return
  }
  func.func @transform_0(%arg0: i32) -> (i32, i32, i32) {
    %c0_i32 = arith.constant 0 : i32
    %c0_i32_0 = arith.constant 0 : i32
    %c0_i32_1 = arith.constant 0 : i32
    return %arg0, %c0_i32, %c0_i32_0 : i32, i32, i32
  }
  func.func @transform_1(%arg0: i32) -> (i32, i32) {
    %c0_i32 = arith.constant 0 : i32
    %c0_i32_0 = arith.constant 0 : i32
    %c0_i32_1 = arith.constant 0 : i32
    return %c0_i32, %c0_i32_0 : i32, i32
  }
  func.func @transform_2(%arg0: i32) -> (i32, i32) {
    %c0_i32 = arith.constant 0 : i32
    %c0_i32_0 = arith.constant 0 : i32
    %c0_i32_1 = arith.constant 0 : i32
    return %c0_i32, %c0_i32_0 : i32, i32
  }
  func.func @transform_3(%arg0: i32) -> (i32, i32) {
    %c0_i32 = arith.constant 0 : i32
    %c0_i32_0 = arith.constant 0 : i32
    %c0_i32_1 = arith.constant 0 : i32
    return %c0_i32, %c0_i32_0 : i32, i32
  }
  func.func @transform_4(%arg0: i32) -> (i32, i32) {
    %c0_i32 = arith.constant 0 : i32
    %c0_i32_0 = arith.constant 0 : i32
    %c0_i32_1 = arith.constant 0 : i32
    return %c0_i32, %c0_i32_0 : i32, i32
  }
  func.func @transform_5(%arg0: i32) -> (i32, i32) {
    %c0_i32 = arith.constant 0 : i32
    %c0_i32_0 = arith.constant 0 : i32
    %c0_i32_1 = arith.constant 0 : i32
    return %c0_i32, %c0_i32_0 : i32, i32
  }
  func.func @transform_6(%arg0: i32) -> (i32, i32, i32) {
    %c0_i32 = arith.constant 0 : i32
    %c0_i32_0 = arith.constant 0 : i32
    %c0_i32_1 = arith.constant 0 : i32
    return %arg0, %c0_i32, %c0_i32_0 : i32, i32, i32
  }
  func.func @transform_7(%arg0: i32) -> (i32, i32, i32) {
    %c0_i32 = arith.constant 0 : i32
    %c0_i32_0 = arith.constant 0 : i32
    %c0_i32_1 = arith.constant 0 : i32
    return %arg0, %c0_i32, %c0_i32_0 : i32, i32, i32
  }
  func.func @transform_8(%arg0: i32) -> (i32, i32, i32) {
    %c0_i32 = arith.constant 0 : i32
    %c0_i32_0 = arith.constant 0 : i32
    %c0_i32_1 = arith.constant 0 : i32
    return %arg0, %c0_i32, %c0_i32_0 : i32, i32, i32
  }
  func.func @transform_9(%arg0: i32) -> (i32, i32, i32) {
    %c0_i32 = arith.constant 0 : i32
    %c0_i32_0 = arith.constant 0 : i32
    %c0_i32_1 = arith.constant 0 : i32
    return %arg0, %c0_i32, %c0_i32_0 : i32, i32, i32
  }
}

</mosaic_0001>

<bundles_post_ra>
// kernel: tpu_custom_call.1
= control target key start
LH: loop header
LB: loop body
LE: loop exit
PB: predicated region body
PF: predicated region fallthrough
CT: control target
= control target key end

     0   :  { %s1595_s0 = inlined_call_operand.vmem [shape: f32[2,16,64], index: 0, kind: input, shape index: {}]   ;;  %s1596_s1 = inlined_call_operand.vmem [shape: f32[64,32], index: 1, kind: input, shape index: {}]   ;;  %s1597_s2 = inlined_call_operand.vmem [shape: f32[1,32], index: 2, kind: input, shape index: {}]   ;;  %s1598_s3 = inlined_call_operand.vmem [shape: f32[32,96], index: 3, kind: input, shape index: {}]   ;;  %s1599_s4 = inlined_call_operand.vmem [shape: f32[32,10], index: 4, kind: input, shape index: {}]   ;;  %s1600_s5 = inlined_call_operand.vmem [shape: f32[1,10], index: 5, kind: input, shape index: {}]   ;;  %s1601_s6 = inlined_call_operand.hbm [shape: f32[2,16,32], index: 6, kind: output, shape index: {0}]   ;;  %s1602_s7 = inlined_call_operand.hbm [shape: f32[2,16,128], index: 7, kind: output, shape index: {1}]   ;;  %s1603_s8 = inlined_call_operand.hbm [shape: f32[2,16,16], index: 8, kind: output, shape index: {2}]   ;;  %s1604_s9 = inlined_call_operand.hbm [shape: f32[2,1,10], index: 9, kind: output, shape index: {3}]  }
   0x1   :  { %1612 = sst [smem:[#allocation12_spill]] %s1595_s0 }
   0x2   :  { %1613 = sst [smem:[#allocation13_spill]] %s1596_s1 }
   0x3   :  { %1614 = sst [smem:[#allocation14_spill]] %s1597_s2 }
   0x4   :  { %15 = vsyncpa [#allocation3], 0 }
   0x5   :  { %17 = vsyncpa [#allocation3 + $0x1], 0 }
   0x6   :  { %18 = vsyncpa [#allocation5], 0 }
   0x7   :  { %20 = vsyncpa [#allocation5 + $0x1], 0 }
   0x8   :  { %21 = vsyncpa [#allocation8], 0 }
   0x9   :  { %23 = vsyncpa [#allocation8 + $0x1], 0  ;;  %s1268_s30 = smov 0   ;;  %s1270_s10 = smov 0  }
   0xa   :  { %s1272_s11 = smov 0   ;;  %s1274_s12 = smov 0  }
   0xb LB: > { %s1289_s13 = sadd.s32 4294967295, %s1206_s12   ;;  %s1605_s14 = sadd.s32 4294967294, %s1206_s12   ;;  %s1206_s12 = sphi %s1274_s12, %s1628_s12   ;;  %s1202_s11 = sphi %s1272_s11, %s1627_s11   ;;  %s1198_s10 = sphi %s1270_s10, %s1626_s10   ;;  %s1194_s30 = sphi %s1268_s30, %s1625_s30  }
   0xc   : > { %s1293_s15 = sadd.s32 1, %s1206_s12   ;;  %s167_s16 = sadd.s32 1, %s1202_s11 }
   0xd   : > { %s164_s17 = ssub.s32 %s1206_s12, %s1293_s15  ;;  %p177_p0 = scmp.ne.s32.totalorder %s1202_s11, %s1198_s10 }
   0xe   : > { %p165_p1 = scmp.eq.s32.totalorder %s164_s17, 0  ;;  %p178_p2 = scmp.eq.s32.totalorder %s1289_s13, 1 }
   0xf   : > { %p183_p3 = scmp.ne.s32.totalorder %s1198_s10, %s1194_s30  ;;  %p184_p4 = scmp.eq.s32.totalorder %s1605_s14, 1 }
  0x10   : > { %s1306_s18 = scalar_select %p165_p1, %s1202_s11, %s167_s16  }
  0x11   : > { %p1308_p5 = por %p178_p2, %p177_p0  ;;  %p1312_p6 = por %p184_p4, %p183_p3 }
  0x12   : > { %p909_p7 = scmp.ge.s32.totalorder %s1206_s12, 1  ;;  %p303_p8 = scmp.lt.s32.totalorder %s1206_s12, 3 }
  0x14   : > { %p304_p9 = pnand %p909_p7, %p303_p8 }
  0x15   : > { %s1617_s1 = sld [smem:[#allocation13_spill]] (!%p304_p9)  ;;  %p353_p10 = scmp.lt.s32.totalorder (!%p304_p9), %s1289_s13, 1 }
  0x16   : > { %307 = sbr.rel (%p304_p9) target bundleno = 1506 (0x5e2), region = 44  ;;  %s1618_s0 = sld [smem:[#allocation12_spill]] (!%p304_p9) }
  0x17   : > { %s1374_s28 = sand.u32 (!%p304_p9), 1, %s1198_s10   ;;  %s1619_s2 = sld [smem:[#allocation14_spill]] (!%p304_p9) }
  0x18   : > { %s1377_s16 = sshll.u32 (!%p304_p9), %s1374_s28, 4  ;;  %s1606_s22 = smov (!%p304_p9), 96  }
  0x19   : > { %s1383_s21 = scalar_lea.vmem (!%p304_p9), [#allocation2], %s1377_s16  ;;  %s1409_s24 = scalar_lea.vmem (!%p304_p9), [#allocation6], %s1377_s16 }
  0x1a   : > { %s1620_s25 = smov (!%p304_p9), 96   ;;  %s710_s14 = sshll.u32 (!%p304_p9), %s1383_s21, 4  ;;  %s1438_s14 = int_to_ptr.vmem [resolvable:$true] %s710_s14 }
  0x1b   : > { %v368_v0 = vld [vmem:[%s1617_s1 + $0x30] sm:$0xff]  ;;  %v369_v1 = vld [vmem:[%s1617_s1 + $0x38] sm:$0xff]  ;;  %v366_v2 = vld [vmem:[%s1617_s1 + $0x20] sm:$0xff]  ;;  %v1208_v3 = vmov 0.0   ;;  %vm1209_vm0 = vmmov 0   ;;  %s354_s29 = scalar_select %p353_p10, %s1289_s13, 1 }
  0x1c   : > { %952 = vmatprep.subr.bf16.mxu0 %v1208_v3  ;;  %v373_v4 = vpack.c.bf16 %v369_v1, %v368_v0  ;;  %v367_v5 = vld [vmem:[%s1617_s1 + $0x28] sm:$0xff]  ;;  %960 = vmatprep.mubr.msk.bf16.mxu0 %vm1209_vm0, %v1208_v3  ;;  %v364_v7 = vld [vmem:[%s1617_s1 + $0x10] sm:$0xff]  ;;  %v365_v8 = vld [vmem:[%s1617_s1 + $0x18] sm:$0xff]  ;;  %vm381_vm1 = vcmask 523264   ;;  %vm426_vm2 = vcmask 261120   ;;  %vm533_vm3 = vcmask 130048  }
  0x1d   : > { %964 = vmatprep.subr.bf16.mxu1 %v1208_v3  ;;  %968 = vmatprep.mubr.msk.bf16.mxu1 %vm1209_vm0, %v1208_v3  ;;  %v372_v6 = vpack.c.bf16 %v367_v5, %v366_v2  ;;  %s933_s23 = sshll.u32 %s354_s29, 4  ;;  %v371_v9 = vpack.c.bf16 %v365_v8, %v364_v7  ;;  %v362_v10 = vld [vmem:[%s1617_s1] sm:$0xff]  ;;  %v363_v11 = vld [vmem:[%s1617_s1 + $0x8] sm:$0xff]  ;;  %v432_v16 = vld [vmem:[%s1598_s3 + $0x10] sm:$0xff] }
  0x1e   : > { %953 = vmatpush3.bf16.msra.mxu0 %v373_v4  ;;  %s357_s17 = scalar_lea.vmem %s1618_s0, %s933_s23  ;;  %v370_v12 = vpack.c.bf16 %v363_v11, %v362_v10  ;;  %v433_v17 = vld [vmem:[%s1598_s3 + $0x18] sm:$0xff]  ;;  %v430_v19 = vld [vmem:[%s1598_s3] sm:$0xff]  ;;  %v431_v20 = vld [vmem:[%s1598_s3 + $0x8] sm:$0xff]  ;;  %s1211_s23 = smov 64  }
  0x1f   : > { %954 = vmatprep.subr.bf16.mxu0 %v1208_v3  ;;  %v359_v13 = vld [vmem:[%s357_s17] sm:$0xff]  ;;  %v360_v14 = vld [vmem:[%s357_s17 + $0x8] sm:$0xff]  ;;  %v435_v18 = vpack.c.bf16 %v433_v17, %v432_v16  ;;  %v434_v21 = vpack.c.bf16 %v431_v20, %v430_v19  ;;  %v632_v63 = vld [vmem:[%s1599_s4 + $0x10] sm:$0xff] }
  0x20   : > { %v361_v15 = vpack.c.bf16 %v360_v14, %v359_v13  ;;  %v915_v22 = vld [vmem:[%s1619_s2] ss:$0 sm:$0xff]  ;;  %v633_v0 = vld [vmem:[%s1599_s4 + $0x18] sm:$0xff]  ;;  %v631_v4 = vld [vmem:[%s1599_s4 + $0x8] sm:$0xff] }
  0x21   : > { %965 = vmatpush3.bf16.msra.mxu1 %v435_v18  ;;  %v635_v1 = vpack.c.bf16 %v633_v0, %v632_v63  ;;  %v630_v2 = vld [vmem:[%s1599_s4] sm:$0xff] }
  0x22   : > { %955 = vmatpush3.bf16.msra.mxu0 %v372_v6  ;;  %966 = vmatprep.subr.bf16.mxu1 %v1208_v3  ;;  %v634_v5 = vpack.c.bf16 %v631_v4, %v630_v2 }
  0x23   : > { %956 = vmatprep.subr.bf16.mxu0 %v1208_v3 }
  0x25   : > { %967 = vmatpush3.bf16.msra.mxu1 %v434_v21 }
  0x26   : > { %957 = vmatpush3.bf16.msra.mxu0 %v371_v9  ;;  %972 = vmatprep.subr.bf16.mxu1 %v1208_v3 }
  0x27   : > { %958 = vmatprep.subr.bf16.mxu0 %v1208_v3 }
  0x2a   : > { %959 = vmatpush3.bf16.msra.mxu0 %v370_v12 }
  0x2b   : > { %978 = vmatprep.subr.bf16.mxu0 %v1208_v3 }
  0x2d   : > { %961 = vmatmul.mubr.msk.bf16.vlgmr.msra.gmra.mxu0 %vm381_vm1, %v361_v15 }
  0x2e   : > { %980 = vmatprep.mubr.msk.bf16.mxu0 %vm1209_vm0, %v1208_v3 }
  0xed   : > { %v419_v23 = vpop.f32.mrf.mxu0 }
  0xee   : > { %v420_v24 = vadd.f32 %v915_v22, %v419_v23 }
  0xef   : > { %v962_v25 = vpop.f32.mrf.mxu0 }
  0xf0   : > { %427 = vst.msk [vmem:[%s1383_s21] sm:$0xff] %vm426_vm2, %v420_v24 }
  0xf1   : > { %v422_v26 = vpop.f32.mrf.mxu0 }
  0xf2   : > { %v423_v27 = vadd.f32 %v915_v22, %v422_v26 }
  0xf3   : > { %v963_v28 = vpop.f32.mrf.mxu0 }
  0xf4   : > { %428 = vst.msk [vmem:[%s1383_s21 + $0x8] sm:$0xff] %vm426_vm2, %v423_v27  ;;  %v429_v29 = vpack.c.bf16 %v423_v27, %v420_v24  ;;  %s1212_s21 = smov [#allocation2]  }
  0xf6   : > { %969 = vmatmul.mubr.msk.bf16.vlgmr.msra.gmra.mxu1 %vm426_vm2, %v429_v29 }
  0xf7   : > { %974 = vmatprep.mubr.msk.bf16.mxu1 %vm1209_vm0, %v1208_v3 }
 0x1b6   : > { %v1392_v30 = vpop.f32.mrf.mxu1 }
 0x1b8   : > { %v970_v31 = vpop.f32.mrf.mxu1 }
 0x1ba   : > { %v1394_v32 = vpop.f32.mrf.mxu1 }
 0x1bb   : > { %v480_v33 = vpack.c.bf16 %v1394_v32, %v1392_v30 }
 0x1bc   : > { %v971_v34 = vpop.f32.mrf.mxu1 }
 0x1bd   : > { %482 = vrot.lane.b32.xlu0 %v480_v33, %s1606_s22  ;;  %s1436_s22 = sshll.u32 %s1289_s13, 8 }
 0x1be   : > { %s1444_s17 = scalar_lea.hbm %s1601_s6, %s1436_s22 }
 0x22f   : > { %v483_v35 = vpop.permute.xlu0 %482 }
 0x230   : > { %v488_v36 = vsel %vm426_vm2, %v483_v35, 0 }
 0x231   : > { %973 = vmatpush3.bf16.xpose.msra.mxu1 %v488_v36 }
 0x232   : > { %984 = vmatprep.subr.bf16.mxu1 %v1208_v3 }
 0x238   : > { %975 = vmatmul.mubr.msk.bf16.vlgmr.msra.gmra.mxu1 %vm426_vm2, %v480_v33 }
 0x239   : > { %988 = vmatprep.mubr.msk.bf16.mxu1 %vm1209_vm0, %v1208_v3  ;;  %985 = vmatpush3.bf16.msra.mxu1 %v635_v1 }
 0x23a   : > { %986 = vmatprep.subr.bf16.mxu1 %v1208_v3 }
 0x23d   : > { %987 = vmatpush3.bf16.msra.mxu1 %v634_v5 }
 0x2f8   : > { %v524_v37 = vpop.f32.mrf.mxu1 }
 0x2f9   : > { %v531_v38 = vmul.f32 0.17677669, %v524_v37 }
 0x2fa   : > { %v976_v39 = vpop.f32.mrf.mxu1 }
 0x2fb   : > { %v534_v40 = vsel %vm533_vm3, %v531_v38, -inf }
 0x2fc   : > { %535 = vmax.xlane.f32.xlu0 %v534_v40  ;;  %v527_v41 = vpop.f32.mrf.mxu1 }
 0x2fd   : > { %v532_v42 = vmul.f32 0.17677669, %v527_v41 }
 0x2fe   : > { %v977_v43 = vpop.f32.mrf.mxu1 }
 0x2ff   : > { %v537_v44 = vsel %vm533_vm3, %v532_v42, -inf }
 0x300   : > { %538 = vmax.xlane.f32.xlu1 %v537_v44 }
 0x385   : > { %v536_v45 = vpop.xlane.xlu0 %535 }
 0x386   : > { %v540_v46 = vsub.f32 %v531_v38, %v536_v45 }
 0x388   : > { %v542_v47 = vmul.f32 1.442695, %v540_v46 }
 0x389   : > { %v539_v48 = vpop.xlane.xlu1 %538 }
 0x38a   : > { %1052 = vpow2.f32 %v542_v47  ;;  %v541_v49 = vsub.f32 %v532_v42, %v539_v48 }
 0x38c   : > { %v544_v50 = vmul.f32 1.442695, %v541_v49 }
 0x38e   : > { %1054 = vpow2.f32 %v544_v50 }
 0x397   : > { %v1053_v51 = vpop.eup %1052 }
 0x398   : > { %v546_v52 = vsel %vm533_vm3, %v1053_v51, 0.0 }
 0x399   : > { %547 = vadd.xlane.f32.xlu1 %v546_v52 }
 0x39b   : > { %v1055_v53 = vpop.eup %1054 }
 0x39c   : > { %v549_v54 = vsel %vm533_vm3, %v1055_v53, 0.0 }
 0x39d   : > { %550 = vadd.xlane.f32.xlu1 %v549_v54 }
 0x3ae   : > { %557 = vrot.lane.b32.xlu1 %v480_v33, %s1211_s23  ;;  %s1060_s23 = scalar_lea.vmem %s1438_s14, 256 }
 0x3af   : > { %p1061_p11 = scmp.ne.s32.totalorder %s1438_s14, %s1060_s23 }
 0x3b1   : > { %p1062_p12 = pnand %p1061_p11, %p1308_p5 }
 0x3b3   : > { %p1063_p13 = pneg %p1062_p12 }
 0x422   : > { %v548_v55 = vpop.xlane.xlu1 %547 }
 0x423   : > { %1056 = vrcp.f32 %v548_v55 }
 0x426   : > { %v551_v56 = vpop.xlane.xlu1 %550 }
 0x427   : > { %1058 = vrcp.f32 %v551_v56 }
 0x42a   : > { %v558_v57 = vpop.permute.xlu1 %557 }
 0x42b   : > { %979 = vmatpush3.bf16.msra.mxu0 %v558_v57 }
 0x430   : > { %v1057_v58 = vpop.eup %1056 }
 0x431   : > { %v554_v59 = vmul.f32 %v1057_v58, %v1053_v51 }
 0x433   : > { %617 = vst.msk [vmem:[%s1409_s24] sm:$0xff] %vm533_vm3, %v554_v59 }
 0x434   : > { %v1059_v60 = vpop.eup %1058 }
 0x435   : > { %v555_v61 = vmul.f32 %v1059_v60, %v1055_v53 }
 0x437   : > { %v556_v62 = vpack.c.bf16 %v555_v61, %v554_v59  ;;  %618 = vst.msk [vmem:[%s1409_s24 + $0x8] sm:$0xff] %vm533_vm3, %v555_v61 }
 0x439   : > { %981 = vmatmul.mubr.msk.bf16.vlgmr.msra.gmra.mxu0 %vm533_vm3, %v556_v62 }
 0x4f9   : > { %v597_v6 = vpop.f32.mrf.mxu0 }
 0x4fa   : > { %606 = vrot.lane.b32.xlu1 %v597_v6, %s1620_s25  ;;  %v619_v9 = vsel %vm426_vm2, %v597_v6, 0.0 }
 0x4fb   : > { %v982_v7 = vpop.f32.mrf.mxu0 }
 0x4fd   : > { %v600_v8 = vpop.f32.mrf.mxu0 }
 0x4fe   : > { %v620_v3 = vsel %vm426_vm2, %v600_v8, 0.0  ;;  %608 = vrot.lane.b32.xlu1 %v600_v8, %s1620_s25  ;;  %s1064_s25 = sshll.u32 %s1212_s21, 4  ;;  %s1065_s25 = int_to_ptr.vmem [resolvable:$false] %s1064_s25 }
 0x4ff   : > { %v621_v10 = vadd.f32 %v620_v3, %v619_v9  ;;  %v983_v11 = vpop.f32.mrf.mxu0  ;;  %s1066_s0 = scalar_lea.vmem %s1065_s25, 512  ;;  %p1067_p0 = scmp.lt.s32.totalorder %s1438_s14, %s1065_s25 }
 0x500   : > { %p1068_p1 = scmp.lt.s32.totalorder %s1066_s0, %s1060_s23 }
 0x501   : > { %v622_v12 = vrot.slane %v621_v10, 4 }
 0x502   : > { %p1069_p2 = por %p1068_p1, %p1067_p0 }
 0x503   : > { %v623_v13 = vadd.f32 %v622_v12, %v621_v10 }
 0x504   : > { %p1070_p3 = pnand %p1069_p2, %p1063_p13 }
 0x505   : > { %v624_v14 = vrot.slane %v623_v13, 2 }
 0x507   : > { %v625_v15 = vadd.f32 %v624_v14, %v623_v13 }
 0x509   : > { %v626_v16 = vrot.slane %v625_v15, 1 }
 0x50b   : > { %v627_v17 = vadd.f32 %v626_v16, %v625_v15 }
 0x50d   : > { %v628_v18 = vmul.f32 0.0625, %v627_v17 }
 0x50f   : > { %v629_v19 = vpack.c.bf16 %v628_v18, %v628_v18 }
 0x511   : > { %989 = vmatmul.mubr.msk.bf16.vlgmr.msra.gmra.mxu1 %vm426_vm2, %v629_v19 }
 0x512   : > { %1073 = shalt.err (!%p1070_p3)
}
 0x513   : > { %s1074_s26 = scalar_lea.hbm %s1444_s17, 256  ;;  %s1078_s21 = scalar_lea.hbm %s1601_s6, 512 }
 0x514   : > { %p1075_p4 = scmp.ne.s32.totalorder %s1444_s17, %s1074_s26  ;;  %p1079_p9 = scmp.lt.s32.totalorder %s1444_s17, %s1601_s6 }
 0x515   : > { %p1080_p10 = scmp.lt.s32.totalorder %s1078_s21, %s1074_s26 }
 0x516   : > { %p1076_p7 = pnand %p1075_p4, %p1308_p5 }
 0x517   : > { %p1081_p11 = por %p1080_p10, %p1079_p9 }
 0x518   : > { %p1077_p8 = pneg %p1076_p7 }
 0x51a   : > { %p1082_p12 = pnand %p1081_p11, %p1077_p8 }
 0x51c   : > { %1085 = shalt.err (!%p1082_p12)
}
 0x51d   : > { %s1608_s0 = smov 128   ;;  %s1610_s29 = smov 8   ;;  %vm612_vm4 = vcmask 785408  }
 0x51e   : > { %s1621_s1 = scalar_lea.sflag [#allocation3], %s1374_s28  ;;  %s339_s2 = scalar_lea.vmem [#allocation4], %s1377_s16 }
 0x51f   : > { %992 = dma.vmem_to_hbm [thread:$0]  (%p1308_p5), %s1438_s14, 256, %s1444_s17, %s1621_s1, %s1608_s0, %s1608_s0, %s1610_s29  }
 0x520   : > { %s726_s23 = sshll.u32 %s339_s2, 4  ;;  %s687_s25 = sand.u32 1, %s1289_s13   ;;  %s1476_s23 = int_to_ptr.vmem [resolvable:$true] %s726_s23 }
 0x521   : > { %s742_s26 = sshll.u32 %s1409_s24, 4  ;;  %s1482_s14 = scalar_lea.hbm %s1602_s7, %s1436_s22  ;;  %s1484_s26 = int_to_ptr.vmem [resolvable:$true] %s742_s26 }
 0x522   : > { %s1491_s24 = scalar_lea.hbm %s1603_s8, %s1436_s22  ;;  %s1493_s1 = scalar_lea.sflag [#allocation5], %s687_s25 }
 0x523   : > { %s1086_s0 = scalar_lea.vmem %s1476_s23, 256  ;;  %s1215_s27 = smov [#allocation4]  }
 0x524   : > { %p1087_p13 = scmp.ne.s32.totalorder %s1476_s23, %s1086_s0  ;;  %s1090_s21 = sshll.u32 %s1215_s27, 4  ;;  %s1091_s21 = int_to_ptr.vmem [resolvable:$false] %s1090_s21 }
 0x525   : > { %s1092_s29 = scalar_lea.vmem %s1091_s21, 512  ;;  %p1093_p2 = scmp.lt.s32.totalorder %s1476_s23, %s1091_s21 }
 0x526   : > { %p1088_p0 = pnand %p1087_p13, %p1308_p5  ;;  %p1094_p3 = scmp.lt.s32.totalorder %s1092_s29, %s1086_s0 }
 0x528   : > { %p1089_p1 = pneg %p1088_p0  ;;  %p1095_p4 = por %p1094_p3, %p1093_p2 }
 0x52a   : > { %p1096_p7 = pnand %p1095_p4, %p1089_p1 }
 0x56c   : > { %v607_v20 = vpop.permute.xlu1 %606 }
 0x56d   : > { %v613_v21 = vsel %vm612_vm4, %v1392_v30, %v607_v20 }
 0x56e   : > { %615 = vst [vmem:[%s339_s2] sm:$0xff] %v613_v21 }
 0x570   : > { %v609_v22 = vpop.permute.xlu1 %608 }
 0x571   : > { %v614_v23 = vsel %vm612_vm4, %v1394_v32, %v609_v22 }
 0x572   : > { %616 = vst [vmem:[%s339_s2 + $0x8] sm:$0xff] %v614_v23 }
 0x573   : > { %1099 = shalt.err (!%p1096_p7)
}
 0x574   : > { %s1100_s22 = scalar_lea.hbm %s1482_s14, 256  ;;  %s1104_s16 = scalar_lea.hbm %s1602_s7, 512 }
 0x575   : > { %p1101_p8 = scmp.ne.s32.totalorder %s1482_s14, %s1100_s22  ;;  %p1105_p11 = scmp.lt.s32.totalorder %s1482_s14, %s1602_s7 }
 0x576   : > { %p1106_p12 = scmp.lt.s32.totalorder %s1104_s16, %s1100_s22 }
 0x577   : > { %p1102_p9 = pnand %p1101_p8, %p1308_p5 }
 0x578   : > { %p1107_p13 = por %p1106_p12, %p1105_p11 }
 0x579   : > { %p1103_p10 = pneg %p1102_p9 }
 0x57b   : > { %p1108_p0 = pnand %p1107_p13, %p1103_p10 }
 0x57d   : > { %1111 = shalt.err (!%p1108_p0)
}
 0x57e   : > { %s1622_s0 = smov 8   ;;  %s1623_s29 = smov 128  }
 0x57f   : > { %993 = dma.vmem_to_hbm [thread:$0]  (%p1308_p5), %s1476_s23, 256, %s1482_s14, %s1493_s1, %s1623_s29, %s1623_s29, %s1622_s0  }
 0x580   : > { %s1112_s21 = scalar_lea.vmem %s1484_s26, 256  ;;  %s1216_s22 = smov [#allocation6]  }
 0x581   : > { %p1113_p1 = scmp.ne.s32.totalorder %s1484_s26, %s1112_s21  ;;  %s1116_s2 = sshll.u32 %s1216_s22, 4  ;;  %s1117_s2 = int_to_ptr.vmem [resolvable:$false] %s1116_s2 }
 0x582   : > { %s1118_s25 = scalar_lea.vmem %s1117_s2, 512  ;;  %p1119_p4 = scmp.lt.s32.totalorder %s1484_s26, %s1117_s2 }
 0x583   : > { %p1114_p2 = pnand %p1113_p1, %p1308_p5  ;;  %p1120_p7 = scmp.lt.s32.totalorder %s1118_s25, %s1112_s21 }
 0x585   : > { %p1115_p3 = pneg %p1114_p2  ;;  %p1121_p8 = por %p1120_p7, %p1119_p4 }
 0x587   : > { %p1122_p9 = pnand %p1121_p8, %p1115_p3 }
 0x589   : > { %1125 = shalt.err (!%p1122_p9)
}
 0x58a   : > { %s1126_s16 = scalar_lea.hbm %s1491_s24, 256  ;;  %s1130_s17 = scalar_lea.hbm %s1603_s8, 512 }
 0x58b   : > { %p1127_p10 = scmp.ne.s32.totalorder %s1491_s24, %s1126_s16  ;;  %p1131_p13 = scmp.lt.s32.totalorder %s1491_s24, %s1603_s8 }
 0x58c   : > { %p1132_p0 = scmp.lt.s32.totalorder %s1130_s17, %s1126_s16 }
 0x58d   : > { %p1128_p11 = pnand %p1127_p10, %p1308_p5 }
 0x58e   : > { %p1133_p1 = por %p1132_p0, %p1131_p13 }
 0x58f   : > { %p1129_p12 = pneg %p1128_p11 }
 0x591   : > { %p1134_p2 = pnand %p1133_p1, %p1129_p12 }
 0x593   : > { %1137 = shalt.err (!%p1134_p2)
}
 0x594   : > { %994 = dma.vmem_to_hbm [thread:$0]  (%p1308_p5), %s1484_s26, 256, %s1491_s24, %s1493_s1, %s1623_s29, %s1623_s29, %s1622_s0   ;;  %vm680_vm5 = vcmask 73728  }
 0x595   : > { %v636_v24 = vld [vmem:[%s1600_s5] sm:$0x1]  ;;  %s930_s25 = sshll.u32 %s1289_s13, 4  ;;  %s352_s16 = scalar_lea.vmem [#allocation7], %s1374_s28 }
 0x596   : > { %s758_s23 = sshll.u32 %s352_s16, 4  ;;  %s1551_s27 = scalar_lea.hbm %s1604_s9, %s930_s25  ;;  %s1553_s23 = int_to_ptr.vmem [resolvable:$true] %s758_s23 }
 0x597   : > { %s698_s26 = scalar_lea.sflag [#allocation8], %s1374_s28  ;;  %s1138_s13 = scalar_lea.vmem %s1553_s23, 16 }
 0x598   : > { %p1139_p3 = scmp.ne.s32.totalorder %s1553_s23, %s1138_s13  ;;  %s1217_s24 = smov [#allocation7]  }
 0x599   : > { %s1142_s1 = sshll.u32 %s1217_s24, 4  ;;  %s1143_s1 = int_to_ptr.vmem [resolvable:$false] %s1142_s1 }
 0x59a   : > { %p1140_p4 = pnand %p1139_p3, %p1308_p5  ;;  %s1144_s0 = scalar_lea.vmem %s1143_s1, 32 }
 0x59b   : > { %p1145_p8 = scmp.lt.s32.totalorder %s1553_s23, %s1143_s1  ;;  %p1146_p9 = scmp.lt.s32.totalorder %s1144_s0, %s1138_s13 }
 0x59c   : > { %p1141_p7 = pneg %p1140_p4 }
 0x59d   : > { %p1147_p10 = por %p1146_p9, %p1145_p8 }
 0x59f   : > { %p1148_p11 = pnand %p1147_p10, %p1141_p7 }
 0x5d1   : > { %v674_v25 = vpop.f32.mrf.mxu1 }
 0x5d2   : > { %v675_v26 = vadd.f32 %v674_v25, %v636_v24 }
 0x5d3   : > { %v990_v27 = vpop.f32.mrf.mxu1 }
 0x5d4   : > { %681 = vst.msk [vmem:[%s352_s16] sm:$0x1] %vm680_vm5, %v675_v26 }
 0x5d5   : > { %v677_v28 = vpop.f32.mrf.mxu1 }
 0x5d6   : > { %1151 = shalt.err (!%p1148_p11)
}
 0x5d7   : > { %s1152_s29 = scalar_lea.hbm %s1551_s27, 16  ;;  %s1156_s21 = scalar_lea.hbm %s1604_s9, 32 }
 0x5d8   : > { %p1153_p12 = scmp.ne.s32.totalorder %s1551_s27, %s1152_s29  ;;  %p1157_p1 = scmp.lt.s32.totalorder %s1551_s27, %s1604_s9 }
 0x5d9   : > { %p1158_p2 = scmp.lt.s32.totalorder %s1156_s21, %s1152_s29 }
 0x5da   : > { %p1154_p13 = pnand %p1153_p12, %p1308_p5 }
 0x5db   : > { %p1159_p3 = por %p1158_p2, %p1157_p1 }
 0x5dc   : > { %p1155_p0 = pneg %p1154_p13 }
 0x5de   : > { %p1160_p4 = pnand %p1159_p3, %p1155_p0 }
 0x5e0   : > { %1163 = shalt.err (!%p1160_p4)
}
 0x5e1   : > { %995 = dma.vmem_to_hbm [thread:$0]  (%p1308_p5), %s1553_s23, 16, %s1551_s27, %s698_s26   ;;  %v991_v29 = vpop.f32.mrf.mxu1 }
 0x5e2 PF: > { %p1013_p7 = scmp.ge.s32.totalorder %s1206_s12, 2  ;;  %s770_s16 = sand.u32 1, %s1194_s30  }
 0x5e3   : > { %s771_s14 = scalar_lea.sflag [#allocation3], %s770_s16 }
 0x5e4   : > { %p1001_p8 = pnand %p1013_p7, %p1312_p6 }
 0x5e6   : > { %p1002_p9 = pneg %p1001_p8 }
 0x5e8   : > { %1181 = dma.done.wait (%p1002_p9), %s771_s14, 256  }
 0x5e9   : > { %1183 = vsyncadd (%p1002_p9), %s771_s14, 4294967040  ;;  %s1624_s17 = sadd.s32 4294967294, %s1206_s12  }
 0x5ea   : > { %s779_s13 = sand.u32 1, %s1624_s17  }
 0x5eb   : > { %s780_s19 = scalar_lea.sflag [#allocation5], %s779_s13 }
 0x5ec   : > { %1185 = dma.done.wait (%p1002_p9), %s780_s19, 512  }
 0x5ed   : > { %1187 = vsyncadd (%p1002_p9), %s780_s19, 4294966784  ;;  %s798_s23 = scalar_lea.sflag [#allocation8], %s770_s16 }
 0x5ee   : > { %1189 = dma.done.wait (%p1002_p9), %s798_s23, 16  }
 0x5ef   : > { %1191 = vsyncadd (%p1002_p9), %s798_s23, 4294967280  ;;  %p26_p5 = scmp.ge.s32.totalorder %s1293_s15, 4   ;;  %s1625_s30 = smov %s1198_s10 }
 0x5f0   : > { %s1626_s10 = smov %s1202_s11  ;;  %s1627_s11 = smov %s1306_s18 }
 0x5f1   : > { %s1628_s12 = smov %s1293_s15  ;;  %28 = sbr.rel (!%p26_p5) target bundleno = 11 (0xb), region = 128 }
 0x5f6   :  { %802 = vsyncpa [#allocation3], 1 }
 0x5f7   :  { %804 = vsyncpa [#allocation3 + $0x1], 1 }
 0x5f8   :  { %805 = vsyncpa [#allocation5], 1 }
 0x5f9   :  { %807 = vsyncpa [#allocation5 + $0x1], 1 }
 0x5fa   :  { %808 = vsyncpa [#allocation8], 1 }
 0x5fb   :  { %810 = vsyncpa [#allocation8 + $0x1], 1 }

</bundles_post_ra>
